<compile_context>
chip_gen: v7x
topology: tpu7x:2x2x1
jax: 0.10.0
libtpu: 0.0.40
codegen_flags: <defaults>
</compile_context>

<pallas_src>
import jax
import jax.numpy as jnp
from jax.experimental import pallas as pl
from jax.experimental.pallas import tpu as pltpu

# Logical (PyTorch) sizes.
D_IN, D_H, D_OUT = 784, 200, 10
# Lane-padded output sizes used inside the kernel (K of layer 1 stays 784).
D_H_PAD, D_OUT_PAD = 256, 128


def _round_up(n, m):
    return ((n + m - 1) // m) * m


def mlp_kernel(x_ref, w1_ref, b1_ref, w2_ref, b2_ref, w3_ref, b3_ref, o_ref):
    # x arrives as f32 (tm, 784); cast to bf16 in-kernel (saves a whole wrapper HBM pass).
    x = x_ref[...].astype(jnp.bfloat16)
    # Layer 1: Linear(784 -> 200, N padded to 256) + ReLU. bf16 MXU, f32 accumulate.
    h1 = jnp.dot(x, w1_ref[...], preferred_element_type=jnp.float32)
    h1 = jnp.maximum(h1 + b1_ref[...], 0.0)
    # Layer 2: Linear(200 -> 200, padded 256 -> 256) + ReLU.
    h2 = jnp.dot(h1.astype(jnp.bfloat16), w2_ref[...], preferred_element_type=jnp.float32)
    h2 = jnp.maximum(h2 + b2_ref[...], 0.0)
    # Layer 3: Linear(200 -> 10, padded 256 -> 128) + ReLU. Padded output lanes are exact
    # zeros (zero weight cols + zero bias), so the wrapper slice [:, :10] is exact.
    h3 = jnp.dot(h2.astype(jnp.bfloat16), w3_ref[...], preferred_element_type=jnp.float32)
    o_ref[...] = jnp.maximum(h3 + b3_ref[...], 0.0).astype(o_ref.dtype)


def mlp_forward(x, w1, b1, w2, b2, w3, b3, *, tm=1024):
    """x: (B, 784) f32.  Weights pre-padded bf16, biases pre-padded f32 (see init_params).
    Returns (B, 10) bf16 activations (ReLU of the final linear)."""
    B = x.shape[0]
    # Effective batch tile: cap at the (8-rounded) batch so small batches use one full tile;
    # for large B the default tm=1024 gives >= 2 tiles, which lets the "parallel" batch axis
    # shard across v7x's two TensorCores.  VMEM at tm=1024 is ~9 MB (safe on v5e/v6e/v7x).
    tm_eff = min(tm, _round_up(B, 8))
    n_tiles = pl.cdiv(B, tm_eff)
    b_pad = n_tiles * tm_eff
    if b_pad != B:
        # Batch-only zero pad (cheap); feature dim is left untouched — no cast/pad copy of x.
        x = jnp.pad(x, ((0, b_pad - B), (0, 0)))

    def const_spec(shape):
        return pl.BlockSpec(shape, lambda i: (0, 0))  # resident across all grid steps

    out = pl.pallas_call(
        mlp_kernel,
        out_shape=jax.ShapeDtypeStruct((b_pad, D_OUT_PAD), jnp.bfloat16),
        grid=(n_tiles,),
        in_specs=[
            pl.BlockSpec((tm_eff, D_IN), lambda i: (i, 0)),   # x tile streams per grid step
            const_spec((D_IN, D_H_PAD)),                      # W1 (784, 256) resident
            const_spec((1, D_H_PAD)),                         # b1 resident
            const_spec((D_H_PAD, D_H_PAD)),                   # W2 resident
            const_spec((1, D_H_PAD)),                         # b2 resident
            const_spec((D_H_PAD, D_OUT_PAD)),                 # W3 resident
            const_spec((1, D_OUT_PAD)),                       # b3 resident
        ],
        out_specs=pl.BlockSpec((tm_eff, D_OUT_PAD), lambda i: (i, 0)),
        compiler_params=pltpu.CompilerParams(
            dimension_semantics=("parallel",),
        ),
    )(x, w1, b1, w2, b2, w3, b3)

    return out[:B, :D_OUT]


def init_params(key):
    """PyTorch nn.Linear default init U(-1/sqrt(fan_in), 1/sqrt(fan_in)) in the real
    (unpadded) region; padded cols/rows are zero.  Weights bf16, biases f32."""
    ks = jax.random.split(key, 6)

    def linear(kw, kb, fan_in, fan_out, fan_in_pad, fan_out_pad):
        bound = 1.0 / jnp.sqrt(float(fan_in))
        w = jax.random.uniform(kw, (fan_in, fan_out), jnp.float32, -bound, bound)
        b = jax.random.uniform(kb, (1, fan_out), jnp.float32, -bound, bound)
        w_pad = jnp.zeros((fan_in_pad, fan_out_pad), jnp.float32).at[:fan_in, :fan_out].set(w)
        b_pad = jnp.zeros((1, fan_out_pad), jnp.float32).at[:, :fan_out].set(b)
        return w_pad.astype(jnp.bfloat16), b_pad

    # Layer 1: K stays 784 (no K padding); only the output side is padded.
    w1, b1 = linear(ks[0], ks[1], D_IN, D_H, D_IN, D_H_PAD)
    w2, b2 = linear(ks[2], ks[3], D_H, D_H, D_H_PAD, D_H_PAD)
    w3, b3 = linear(ks[4], ks[5], D_H, D_OUT, D_H_PAD, D_OUT_PAD)
    return w1, b1, w2, b2, w3, b3


def _reference(x, params):
    """Pure-JAX reference replicating the kernel's bf16-input / f32-accumulate math."""
    w1, b1, w2, b2, w3, b3 = params
    xb = x.astype(jnp.bfloat16).astype(jnp.float32)
    w1f, w2f, w3f = (w.astype(jnp.float32) for w in (w1, w2, w3))
    h = jnp.maximum(xb @ w1f + b1, 0.0)
    h = jnp.maximum(h.astype(jnp.bfloat16).astype(jnp.float32) @ w2f + b2, 0.0)
    h = jnp.maximum(h.astype(jnp.bfloat16).astype(jnp.float32) @ w3f + b3, 0.0)
    return h[:, :D_OUT].astype(jnp.bfloat16)


if __name__ == "__main__":
    key = jax.random.PRNGKey(0)
    k_x, k_p = jax.random.split(key)

    B = 8  # small test batch; wrapper handles tiling/padding internally
    x = jax.random.normal(k_x, (B, D_IN), jnp.float32)
    params = init_params(k_p)

    out = mlp_forward(x, *params)
    jax.block_until_ready(out)

    ref = _reference(x, params)
    assert out.shape == (B, D_OUT), out.shape
    err = jnp.max(jnp.abs(out.astype(jnp.float32) - ref.astype(jnp.float32)))
    assert jnp.allclose(out.astype(jnp.float32), ref.astype(jnp.float32),
                        atol=2e-2, rtol=2e-2), float(err)

    print("KERNEL_OK")
</pallas_src>

<mosaic_0001>
module attributes {stable_mosaic.version = 11 : i64} {
  func.func @mlp_kernel(%arg0: i32, %arg1: memref<8x784xf32, #tpu.memory_space<vmem>>, %arg2: memref<784x256xbf16, #tpu.memory_space<vmem>>, %arg3: memref<1x256xf32, #tpu.memory_space<vmem>>, %arg4: memref<256x256xbf16, #tpu.memory_space<vmem>>, %arg5: memref<1x256xf32, #tpu.memory_space<vmem>>, %arg6: memref<256x128xbf16, #tpu.memory_space<vmem>>, %arg7: memref<1x128xf32, #tpu.memory_space<vmem>>, %arg8: memref<8x128xbf16, #tpu.memory_space<vmem>>) attributes {dimension_semantics = [#tpu.dimension_semantics<parallel>], iteration_bounds = array<i64: 1>, scalar_prefetch = 0 : i64, scratch_operands = 0 : i64, tpu.core_type = #tpu.core_type<tc>, window_params = [{transform_indices = @transform_0, window_bounds = array<i64: 8, 784>}, {pipeline_mode = #tpu.pipeline_mode<synchronous>, transform_indices = @transform_1, window_bounds = array<i64: 784, 256>}, {pipeline_mode = #tpu.pipeline_mode<synchronous>, transform_indices = @transform_2, window_bounds = array<i64: 1, 256>}, {pipeline_mode = #tpu.pipeline_mode<synchronous>, transform_indices = @transform_3, window_bounds = array<i64: 256, 256>}, {pipeline_mode = #tpu.pipeline_mode<synchronous>, transform_indices = @transform_4, window_bounds = array<i64: 1, 256>}, {pipeline_mode = #tpu.pipeline_mode<synchronous>, transform_indices = @transform_5, window_bounds = array<i64: 256, 128>}, {pipeline_mode = #tpu.pipeline_mode<synchronous>, transform_indices = @transform_6, window_bounds = array<i64: 1, 128>}, {transform_indices = @transform_7, window_bounds = array<i64: 8, 128>}]} {
    %c0 = arith.constant 0 : index
    %c0_0 = arith.constant 0 : index
    %0 = vector.load %arg1[%c0, %c0_0] : memref<8x784xf32, #tpu.memory_space<vmem>>, vector<8x784xf32>
    %1 = arith.truncf %0 : vector<8x784xf32> to vector<8x784xbf16>
    %c0_1 = arith.constant 0 : index
    %c0_2 = arith.constant 0 : index
    %2 = vector.load %arg2[%c0_1, %c0_2] : memref<784x256xbf16, #tpu.memory_space<vmem>>, vector<784x256xbf16>
    %cst = arith.constant dense<0.000000e+00> : vector<8x256xf32>
    %3 = tpu.matmul %1, %2, %cst {dimension_numbers = #tpu.dot_dimension_numbers<[1], [0], [0], [1], [0, 0, 1, 1], [], []>} : vector<8x784xbf16>, vector<784x256xbf16>, vector<8x256xf32> -> vector<8x256xf32>
    %c0_3 = arith.constant 0 : index
    %c0_4 = arith.constant 0 : index
    %4 = vector.load %arg3[%c0_3, %c0_4] : memref<1x256xf32, #tpu.memory_space<vmem>>, vector<1x256xf32>
    %5 = vector.broadcast %4 : vector<1x256xf32> to vector<8x256xf32>
    %6 = arith.addf %3, %5 : vector<8x256xf32>
    %cst_5 = arith.constant 0.000000e+00 : f32
    %7 = vector.broadcast %cst_5 : f32 to vector<8x256xf32>
    %8 = arith.maximumf %6, %7 : vector<8x256xf32>
    %9 = arith.truncf %8 : vector<8x256xf32> to vector<8x256xbf16>
    %c0_6 = arith.constant 0 : index
    %c0_7 = arith.constant 0 : index
    %10 = vector.load %arg4[%c0_6, %c0_7] : memref<256x256xbf16, #tpu.memory_space<vmem>>, vector<256x256xbf16>
    %cst_8 = arith.constant dense<0.000000e+00> : vector<8x256xf32>
    %11 = tpu.matmul %9, %10, %cst_8 {dimension_numbers = #tpu.dot_dimension_numbers<[1], [0], [0], [1], [0, 0, 1, 1], [], []>} : vector<8x256xbf16>, vector<256x256xbf16>, vector<8x256xf32> -> vector<8x256xf32>
    %c0_9 = arith.constant 0 : index
    %c0_10 = arith.constant 0 : index
    %12 = vector.load %arg5[%c0_9, %c0_10] : memref<1x256xf32, #tpu.memory_space<vmem>>, vector<1x256xf32>
    %13 = vector.broadcast %12 : vector<1x256xf32> to vector<8x256xf32>
    %14 = arith.addf %11, %13 : vector<8x256xf32>
    %cst_11 = arith.constant 0.000000e+00 : f32
    %15 = vector.broadcast %cst_11 : f32 to vector<8x256xf32>
    %16 = arith.maximumf %14, %15 : vector<8x256xf32>
    %17 = arith.truncf %16 : vector<8x256xf32> to vector<8x256xbf16>
    %c0_12 = arith.constant 0 : index
    %c0_13 = arith.constant 0 : index
    %18 = vector.load %arg6[%c0_12, %c0_13] : memref<256x128xbf16, #tpu.memory_space<vmem>>, vector<256x128xbf16>
    %cst_14 = arith.constant dense<0.000000e+00> : vector<8x128xf32>
    %19 = tpu.matmul %17, %18, %cst_14 {dimension_numbers = #tpu.dot_dimension_numbers<[1], [0], [0], [1], [0, 0, 1, 1], [], []>} : vector<8x256xbf16>, vector<256x128xbf16>, vector<8x128xf32> -> vector<8x128xf32>
    %c0_15 = arith.constant 0 : index
    %c0_16 = arith.constant 0 : index
    %20 = vector.load %arg7[%c0_15, %c0_16] : memref<1x128xf32, #tpu.memory_space<vmem>>, vector<1x128xf32>
    %21 = vector.broadcast %20 : vector<1x128xf32> to vector<8x128xf32>
    %22 = arith.addf %19, %21 : vector<8x128xf32>
    %cst_17 = arith.constant 0.000000e+00 : f32
    %23 = vector.broadcast %cst_17 : f32 to vector<8x128xf32>
    %24 = arith.maximumf %22, %23 : vector<8x128xf32>
    %25 = arith.truncf %24 : vector<8x128xf32> to vector<8x128xbf16>
    %c0_18 = arith.constant 0 : index
    %c0_19 = arith.constant 0 : index
    %26 = vector.load %arg8[%c0_18, %c0_19] : memref<8x128xbf16, #tpu.memory_space<vmem>>, vector<8x128xbf16>
    tpu.vector_store %arg8[%c0_18, %c0_19], %25 {strides = array<i32>} : memref<8x128xbf16, #tpu.memory_space<vmem>>, vector<8x128xbf16>,
    return
  }
  func.func @transform_0(%arg0: i32) -> (i32, i32) {
    %c0_i32 = arith.constant 0 : i32
    %c0_i32_0 = arith.constant 0 : i32
    return %arg0, %c0_i32 : i32, i32
  }
  func.func @transform_1(%arg0: i32) -> (i32, i32) {
    %c0_i32 = arith.constant 0 : i32
    %c0_i32_0 = arith.constant 0 : i32
    %c0_i32_1 = arith.constant 0 : i32
    return %c0_i32, %c0_i32_0 : i32, i32
  }
  func.func @transform_2(%arg0: i32) -> (i32, i32) {
    %c0_i32 = arith.constant 0 : i32
    %c0_i32_0 = arith.constant 0 : i32
    %c0_i32_1 = arith.constant 0 : i32
    return %c0_i32, %c0_i32_0 : i32, i32
  }
  func.func @transform_3(%arg0: i32) -> (i32, i32) {
    %c0_i32 = arith.constant 0 : i32
    %c0_i32_0 = arith.constant 0 : i32
    %c0_i32_1 = arith.constant 0 : i32
    return %c0_i32, %c0_i32_0 : i32, i32
  }
  func.func @transform_4(%arg0: i32) -> (i32, i32) {
    %c0_i32 = arith.constant 0 : i32
    %c0_i32_0 = arith.constant 0 : i32
    %c0_i32_1 = arith.constant 0 : i32
    return %c0_i32, %c0_i32_0 : i32, i32
  }
  func.func @transform_5(%arg0: i32) -> (i32, i32) {
    %c0_i32 = arith.constant 0 : i32
    %c0_i32_0 = arith.constant 0 : i32
    %c0_i32_1 = arith.constant 0 : i32
    return %c0_i32, %c0_i32_0 : i32, i32
  }
  func.func @transform_6(%arg0: i32) -> (i32, i32) {
    %c0_i32 = arith.constant 0 : i32
    %c0_i32_0 = arith.constant 0 : i32
    %c0_i32_1 = arith.constant 0 : i32
    return %c0_i32, %c0_i32_0 : i32, i32
  }
  func.func @transform_7(%arg0: i32) -> (i32, i32) {
    %c0_i32 = arith.constant 0 : i32
    %c0_i32_0 = arith.constant 0 : i32
    return %arg0, %c0_i32 : i32, i32
  }
}

</mosaic_0001>

<bundles_post_ra>
// kernel: tpu_custom_call.1
= control target key start
LH: loop header
LB: loop body
LE: loop exit
PB: predicated region body
PF: predicated region fallthrough
CT: control target
= control target key end

     0   :  { %12 = vsyncpa [#allocation3], 0  ;;  %s1957_s0 = inlined_call_operand.hbm [shape: f32[8,784], index: 0, kind: input, shape index: {}]   ;;  %s1958_s1 = inlined_call_operand.hbm [shape: bf16[784,256], index: 1, kind: input, shape index: {}]   ;;  %s1959_s2 = inlined_call_operand.vmem [shape: f32[1,256], index: 2, kind: input, shape index: {}]   ;;  %s1960_s3 = inlined_call_operand.hbm [shape: bf16[256,256], index: 3, kind: input, shape index: {}]   ;;  %s1961_s4 = inlined_call_operand.vmem [shape: f32[1,256], index: 4, kind: input, shape index: {}]   ;;  %s1962_s5 = inlined_call_operand.hbm [shape: bf16[256,128], index: 5, kind: input, shape index: {}]   ;;  %s1963_s6 = inlined_call_operand.vmem [shape: f32[1,128], index: 6, kind: input, shape index: {}]   ;;  %s1964_s7 = inlined_call_operand.hbm [shape: bf16[8,128], index: 7, kind: output, shape index: {}]  }
   0x1   :  { %13 = vsyncpa [#allocation6], 0 }
   0x2   :  { %14 = vsyncpa [#allocation9], 0 }
   0x3   :  { %15 = vsyncpa [#allocation4], 0  ;;  %s1832_s24 = smov [#allocation5]   ;;  %s1714_s28 = scalar_lea.hbm %s1958_s1, 12544 }
   0x4   :  { %s31_s25 = sshll.u32 %s1832_s24, 4  ;;  %p1715_p0 = scmp.ne.s32.totalorder %s1958_s1, %s1714_s28  ;;  %s32_s25 = int_to_ptr.vmem [resolvable:$true] %s31_s25 }
   0x5   :  { %p1718_p1 = scmp.lt.u32.totalorder %s1714_s28, %s1958_s1 }
   0x7   :  { %p1720_p2 = pnand %p1718_p1, %p1715_p0 }
   0x9   :  { %1723 = shalt.err (!%p1720_p2)
}
   0xa   :  { %s1724_s10 = scalar_lea.vmem %s32_s25, 12544  ;;  %p1729_p4 = scmp.lt.s32.totalorder %s32_s25, %s32_s25 }
   0xb   :  { %p1725_p3 = scmp.ne.s32.totalorder %s32_s25, %s1724_s10  ;;  %p1730_p5 = scmp.lt.s32.totalorder %s1724_s10, %s1724_s10 }
   0xd   :  { %p1731_p6 = por %p1730_p5, %p1729_p4 }
   0xf   :  { %p1732_p7 = pnand %p1731_p6, %p1725_p3 }
  0x11   :  { %1735 = shalt.err (!%p1732_p7)
}
  0x12   :  { %s1833_s11 = smov 128   ;;  %s1834_s12 = smov 8  }
  0x13   :  { %37 = dma.hbm_to_vmem [thread:$0]  %s1958_s1, 12544, %s32_s25, [#allocation6], %s1833_s11, %s1833_s11, %s1834_s12  }
  0x14   :  { %s1835_s15 = smov [#allocation2]   ;;  %s1836_s17 = smov [#allocation7]  }
  0x15   :  { %s22_s16 = sshll.u32 %s1835_s15, 4  ;;  %s45_s18 = sshll.u32 %s1836_s17, 4  ;;  %s23_s16 = int_to_ptr.vmem [resolvable:$true] %s22_s16  ;;  %s46_s18 = int_to_ptr.vmem [resolvable:$true] %s45_s18 }
  0x16   :  { %s1736_s21 = scalar_lea.hbm %s1957_s0, 896 }
  0x17   :  { %p1737_p8 = scmp.ne.s32.totalorder %s1957_s0, %s1736_s21  ;;  %p1740_p9 = scmp.lt.u32.totalorder %s1736_s21, %s1957_s0 }
  0x19   :  { %p1742_p10 = pnand %p1740_p9, %p1737_p8 }
  0x1b   :  { %1745 = shalt.err (!%p1742_p10)
}
  0x1c   :  { %s1746_s1 = scalar_lea.vmem %s23_s16, 896  ;;  %p1751_p12 = scmp.lt.s32.totalorder %s23_s16, %s23_s16 }
  0x1d   :  { %p1747_p11 = scmp.ne.s32.totalorder %s23_s16, %s1746_s1  ;;  %p1752_p13 = scmp.lt.s32.totalorder %s1746_s1, %s1746_s1 }
  0x1f   :  { %p1753_p0 = por %p1752_p13, %p1751_p12 }
  0x21   :  { %p1754_p1 = pnand %p1753_p0, %p1747_p11 }
  0x23   :  { %1757 = shalt.err (!%p1754_p1)
}
  0x24   :  { %25 = dma.hbm_to_vmem [thread:$0]  %s1957_s0, 896, %s23_s16, [#allocation3]  }
  0x25   :  { %s1758_s30 = scalar_lea.hbm %s1960_s3, 4096 }
  0x26   :  { %p1759_p2 = scmp.ne.s32.totalorder %s1960_s3, %s1758_s30  ;;  %p1762_p3 = scmp.lt.u32.totalorder %s1758_s30, %s1960_s3 }
  0x28   :  { %p1764_p4 = pnand %p1762_p3, %p1759_p2 }
  0x2a   :  { %1767 = shalt.err (!%p1764_p4)
}
  0x2b   :  { %s1768_s14 = scalar_lea.vmem %s46_s18, 4096  ;;  %p1773_p6 = scmp.lt.s32.totalorder %s46_s18, %s46_s18 }
  0x2c   :  { %p1769_p5 = scmp.ne.s32.totalorder %s46_s18, %s1768_s14  ;;  %p1774_p7 = scmp.lt.s32.totalorder %s1768_s14, %s1768_s14 }
  0x2e   :  { %p1775_p8 = por %p1774_p7, %p1773_p6 }
  0x30   :  { %p1776_p9 = pnand %p1775_p8, %p1769_p5 }
  0x32   :  { %1779 = shalt.err (!%p1776_p9)
}
  0x33   :  { %51 = dma.hbm_to_vmem [thread:$0]  %s1960_s3, 4096, %s46_s18, [#allocation6], %s1833_s11, %s1833_s11, %s1834_s12  }
  0x34   :  { %s1837_s16 = smov [#allocation8]   ;;  %s1780_s21 = scalar_lea.hbm %s1962_s5, 2048 }
  0x35   :  { %s59_s17 = sshll.u32 %s1837_s16, 4  ;;  %p1781_p10 = scmp.ne.s32.totalorder %s1962_s5, %s1780_s21  ;;  %s60_s17 = int_to_ptr.vmem [resolvable:$true] %s59_s17 }
  0x36   :  { %p1784_p11 = scmp.lt.u32.totalorder %s1780_s21, %s1962_s5 }
  0x38   :  { %p1786_p12 = pnand %p1784_p11, %p1781_p10 }
  0x3a   :  { %1789 = shalt.err (!%p1786_p12)
}
  0x3b   :  { %s1790_s1 = scalar_lea.vmem %s60_s17, 2048  ;;  %p1795_p0 = scmp.lt.s32.totalorder %s60_s17, %s60_s17 }
  0x3c   :  { %p1791_p13 = scmp.ne.s32.totalorder %s60_s17, %s1790_s1  ;;  %p1796_p1 = scmp.lt.s32.totalorder %s1790_s1, %s1790_s1 }
  0x3e   :  { %p1797_p2 = por %p1796_p1, %p1795_p0 }
  0x40   :  { %p1798_p3 = pnand %p1797_p2, %p1791_p13 }
  0x42   :  { %1801 = shalt.err (!%p1798_p3)
}
  0x43   :  { %s1838_s3 = smov 64   ;;  %s1839_s11 = smov 4  }
  0x44   :  { %65 = dma.hbm_to_vmem [thread:$0]  %s1962_s5, 2048, %s60_s17, [#allocation9], %s1838_s3, %s1838_s3, %s1839_s11  }
  0x45   :  { %1824 = dma.done.wait [#allocation3], 896  }
  0x46   :  { %1825 = vsyncadd [#allocation3], 4294966400 }
  0x47   :  { %1826 = dma.done.wait [#allocation6], 16640  }
  0x48   :  { %1827 = vsyncadd [#allocation6], 4294950656 }
  0x49   :  { %1828 = dma.done.wait [#allocation9], 2048  }
  0x4a   :  { %1829 = vsyncadd [#allocation9], 4294965248  ;;  %v1503_v0 = vld [vmem:[#allocation5 + $0x104] ss:$8 sps:$4 sm:$0xff]   ;;  %v1505_v1 = vld [vmem:[#allocation5 + $0x100] ss:$8 sps:$4 sm:$0xff]  }
  0x4b   :  { %740 = vmatprep.subr.bf16.mxu0 %v1503_v0  ;;  %v1506_v2 = vld [vmem:[#allocation5 + $0x114] ss:$8 sps:$4 sm:$0xff]   ;;  %v1508_v3 = vld [vmem:[#allocation5 + $0x110] ss:$8 sps:$4 sm:$0xff]   ;;  %v1509_v4 = vld [vmem:[#allocation5 + $0x124] ss:$8 sps:$4 sm:$0xff]  }
  0x4c   :  { %741 = vmatpush1.bf16.msra.mxu0 %v1505_v1  ;;  %v1511_v5 = vld [vmem:[#allocation5 + $0x120] ss:$8 sps:$4 sm:$0xff]   ;;  %v1512_v6 = vld [vmem:[#allocation5 + $0x134] ss:$8 sps:$4 sm:$0xff]   ;;  %v1514_v7 = vld [vmem:[#allocation5 + $0x130] ss:$8 sps:$4 sm:$0xff]  }
  0x4d   :  { %742 = vmatprep.subr.bf16.mxu0 %v1506_v2  ;;  %v1515_v8 = vld [vmem:[#allocation5 + $0x144] ss:$8 sps:$4 sm:$0xff]   ;;  %v1517_v9 = vld [vmem:[#allocation5 + $0x140] ss:$8 sps:$4 sm:$0xff]   ;;  %v1518_v10 = vld [vmem:[#allocation5 + $0x154] ss:$8 sps:$4 sm:$0xff]  }
  0x4e   :  { %v1520_v11 = vld [vmem:[#allocation5 + $0x150] ss:$8 sps:$4 sm:$0xff]   ;;  %v1521_v12 = vld [vmem:[#allocation5 + $0x164] ss:$8 sps:$4 sm:$0xff]   ;;  %v1523_v15 = vld [vmem:[#allocation5 + $0x160] ss:$8 sps:$4 sm:$0xff]  }
  0x4f   :  { %v84_v13 = vld [vmem:[#allocation2 + $0x18] sm:$0xff]  ;;  %v1524_v16 = vld [vmem:[#allocation5 + $0x174] ss:$8 sps:$4 sm:$0xff]   ;;  %v1526_v18 = vld [vmem:[#allocation5 + $0x170] ss:$8 sps:$4 sm:$0xff]   ;;  %vm695_vm0 = vcmask 130048  }
  0x50   :  { %743 = vmatpush1.bf16.msra.mxu0 %v1508_v3  ;;  %v91_v14 = vpack.c.bf16 %v84_v13, %v84_v13  ;;  %v1557_v17 = vld [vmem:[#allocation5 + $0x4] ss:$8 sps:$4 sm:$0xff]   ;;  %v1562_v20 = vld [vmem:[#allocation5] ss:$8 sps:$4 sm:$0xff]   ;;  %v1563_v21 = vld [vmem:[#allocation5 + $0x14] ss:$8 sps:$4 sm:$0xff]  }
  0x51   :  { %744 = vmatprep.subr.bf16.mxu0 %v1509_v4  ;;  %v1527_v19 = vld [vmem:[#allocation5 + $0x184] ss:$8 sps:$4 sm:$0xff]   ;;  %699 = vmatprep.subr.bf16.mxu1 %v1557_v17  ;;  %v1568_v22 = vld [vmem:[#allocation5 + $0x10] ss:$8 sps:$4 sm:$0xff]   ;;  %v1529_v24 = vld [vmem:[#allocation5 + $0x180] ss:$8 sps:$4 sm:$0xff]  }
  0x52   :  { %772 = vmatprep.mubr.bf16.mxu0 %v91_v14  ;;  %700 = vmatpush1.bf16.msra.mxu1 %v1562_v20  ;;  %v1569_v23 = vld [vmem:[#allocation5 + $0x24] ss:$8 sps:$4 sm:$0xff]   ;;  %v1530_v25 = vld [vmem:[#allocation5 + $0x194] ss:$8 sps:$4 sm:$0xff]   ;;  %v1574_v26 = vld [vmem:[#allocation5 + $0x20] ss:$8 sps:$4 sm:$0xff]  }
  0x53   :  { %701 = vmatprep.subr.bf16.mxu1 %v1563_v21  ;;  %v1575_v27 = vld [vmem:[#allocation5 + $0x34] ss:$8 sps:$4 sm:$0xff]   ;;  %v1532_v28 = vld [vmem:[#allocation5 + $0x190] ss:$8 sps:$4 sm:$0xff]   ;;  %v1533_v29 = vld [vmem:[#allocation5 + $0x1a4] ss:$8 sps:$4 sm:$0xff]  }
  0x54   :  { %745 = vmatpush1.bf16.msra.mxu0 %v1511_v5  ;;  %v1580_v30 = vld [vmem:[#allocation5 + $0x30] ss:$8 sps:$4 sm:$0xff]   ;;  %v1581_v31 = vld [vmem:[#allocation5 + $0x44] ss:$8 sps:$4 sm:$0xff]   ;;  %v1535_v32 = vld [vmem:[#allocation5 + $0x1a0] ss:$8 sps:$4 sm:$0xff]  }
  0x55   :  { %746 = vmatprep.subr.bf16.mxu0 %v1512_v6  ;;  %v1536_v33 = vld [vmem:[#allocation5 + $0x1b4] ss:$8 sps:$4 sm:$0xff]   ;;  %v1586_v34 = vld [vmem:[#allocation5 + $0x40] ss:$8 sps:$4 sm:$0xff]   ;;  %v1538_v36 = vld [vmem:[#allocation5 + $0x1b0] ss:$8 sps:$4 sm:$0xff]  }
  0x56   :  { %702 = vmatpush1.bf16.msra.mxu1 %v1568_v22  ;;  %v1587_v35 = vld [vmem:[#allocation5 + $0x54] ss:$8 sps:$4 sm:$0xff]   ;;  %v1539_v37 = vld [vmem:[#allocation5 + $0x1c4] ss:$8 sps:$4 sm:$0xff]   ;;  %v1592_v38 = vld [vmem:[#allocation5 + $0x50] ss:$8 sps:$4 sm:$0xff]  }
  0x57   :  { %703 = vmatprep.subr.bf16.mxu1 %v1569_v23  ;;  %v1593_v39 = vld [vmem:[#allocation5 + $0x64] ss:$8 sps:$4 sm:$0xff]   ;;  %v1541_v40 = vld [vmem:[#allocation5 + $0x1c0] ss:$8 sps:$4 sm:$0xff]   ;;  %v1542_v41 = vld [vmem:[#allocation5 + $0x1d4] ss:$8 sps:$4 sm:$0xff]  }
  0x58   :  { %747 = vmatpush1.bf16.msra.mxu0 %v1514_v7  ;;  %v1598_v42 = vld [vmem:[#allocation5 + $0x60] ss:$8 sps:$4 sm:$0xff]   ;;  %v1599_v43 = vld [vmem:[#allocation5 + $0x74] ss:$8 sps:$4 sm:$0xff]   ;;  %v1544_v44 = vld [vmem:[#allocation5 + $0x1d0] ss:$8 sps:$4 sm:$0xff]  }
  0x59   :  { %748 = vmatprep.subr.bf16.mxu0 %v1515_v8  ;;  %v1545_v45 = vld [vmem:[#allocation5 + $0x1e4] ss:$8 sps:$4 sm:$0xff]   ;;  %v1604_v46 = vld [vmem:[#allocation5 + $0x70] ss:$8 sps:$4 sm:$0xff]   ;;  %v1547_v48 = vld [vmem:[#allocation5 + $0x1e0] ss:$8 sps:$4 sm:$0xff]  }
  0x5a   :  { %704 = vmatpush1.bf16.msra.mxu1 %v1574_v26  ;;  %v1605_v47 = vld [vmem:[#allocation5 + $0x84] ss:$8 sps:$4 sm:$0xff]   ;;  %v1548_v49 = vld [vmem:[#allocation5 + $0x1f4] ss:$8 sps:$4 sm:$0xff]   ;;  %v1610_v50 = vld [vmem:[#allocation5 + $0x80] ss:$8 sps:$4 sm:$0xff]  }
  0x5b   :  { %705 = vmatprep.subr.bf16.mxu1 %v1575_v27  ;;  %v1550_v51 = vld [vmem:[#allocation5 + $0x1f0] ss:$8 sps:$4 sm:$0xff]   ;;  %v1611_v52 = vld [vmem:[#allocation5 + $0x94] ss:$8 sps:$4 sm:$0xff]   ;;  %v1553_v54 = vld [vmem:[#allocation5 + $0x204] ss:$8 sps:$4 sm:$0xff]  }
  0x5c   :  { %749 = vmatpush1.bf16.msra.mxu0 %v1517_v9  ;;  %v83_v53 = vld [vmem:[#allocation2 + $0x10] sm:$0xff]  ;;  %v1617_v56 = vld [vmem:[#allocation5 + $0xa4] ss:$8 sps:$4 sm:$0xff]   ;;  %v86_v58 = vld [vmem:[#allocation2 + $0x28] sm:$0xff] }
  0x5d   :  { %750 = vmatprep.subr.bf16.mxu0 %v1518_v10  ;;  %v1616_v55 = vld [vmem:[#allocation5 + $0x90] ss:$8 sps:$4 sm:$0xff]   ;;  %v90_v57 = vpack.c.bf16 %v83_v53, %v83_v53  ;;  %v1551_v59 = vld [vmem:[#allocation5 + $0x200] ss:$8 sps:$4 sm:$0xff]   ;;  %v93_v60 = vpack.c.bf16 %v86_v58, %v86_v58  ;;  %v1556_v61 = vld [vmem:[#allocation5 + $0x214] ss:$8 sps:$4 sm:$0xff]  }
  0x5e   :  { %706 = vmatpush1.bf16.msra.mxu1 %v1580_v30  ;;  %v1622_v62 = vld [vmem:[#allocation5 + $0xa0] ss:$8 sps:$4 sm:$0xff]   ;;  %v1623_v63 = vld [vmem:[#allocation5 + $0xb4] ss:$8 sps:$4 sm:$0xff]   ;;  %v1554_v1 = vld [vmem:[#allocation5 + $0x210] ss:$8 sps:$4 sm:$0xff]  }
  0x5f   :  { %707 = vmatprep.subr.bf16.mxu1 %v1581_v31  ;;  %v82_v0 = vld [vmem:[#allocation2 + $0x8] sm:$0xff]  ;;  %v1561_v3 = vld [vmem:[#allocation5 + $0x224] ss:$8 sps:$4 sm:$0xff]   ;;  %v1559_v6 = vld [vmem:[#allocation5 + $0x220] ss:$8 sps:$4 sm:$0xff]  }
  0x60   :  { %751 = vmatpush1.bf16.msra.mxu0 %v1520_v11  ;;  %v89_v2 = vpack.c.bf16 %v82_v0, %v82_v0  ;;  %v1628_v4 = vld [vmem:[#allocation5 + $0xb0] ss:$8 sps:$4 sm:$0xff]   ;;  %v1629_v5 = vld [vmem:[#allocation5 + $0xc4] ss:$8 sps:$4 sm:$0xff]   ;;  %v1567_v7 = vld [vmem:[#allocation5 + $0x234] ss:$8 sps:$4 sm:$0xff]  }
  0x61   :  { %752 = vmatprep.subr.bf16.mxu0 %v1521_v12  ;;  %v1634_v8 = vld [vmem:[#allocation5 + $0xc0] ss:$8 sps:$4 sm:$0xff]   ;;  %v1635_v9 = vld [vmem:[#allocation5 + $0xd4] ss:$8 sps:$4 sm:$0xff]   ;;  %v1565_v10 = vld [vmem:[#allocation5 + $0x230] ss:$8 sps:$4 sm:$0xff]  }
  0x62   :  { %708 = vmatpush1.bf16.msra.mxu1 %v1586_v34  ;;  %731 = vmatprep.mubr.bf16.mxu1 %v89_v2  ;;  %v1573_v11 = vld [vmem:[#allocation5 + $0x244] ss:$8 sps:$4 sm:$0xff]   ;;  %v1640_v12 = vld [vmem:[#allocation5 + $0xd0] ss:$8 sps:$4 sm:$0xff]   ;;  %v1571_v14 = vld [vmem:[#allocation5 + $0x240] ss:$8 sps:$4 sm:$0xff]  }
  0x63   :  { %709 = vmatprep.subr.bf16.mxu1 %v1587_v35  ;;  %v1641_v13 = vld [vmem:[#allocation5 + $0xe4] ss:$8 sps:$4 sm:$0xff]   ;;  %v1647_v17 = vld [vmem:[#allocation5 + $0xf4] ss:$8 sps:$4 sm:$0xff]   ;;  %v1649_v20 = vld [vmem:[#allocation5 + $0xf0] ss:$8 sps:$4 sm:$0xff]  }
  0x64   :  { %753 = vmatpush1.bf16.msra.mxu0 %v1523_v15  ;;  %v1579_v15 = vld [vmem:[#allocation5 + $0x254] ss:$8 sps:$4 sm:$0xff]   ;;  %v81_v21 = vld [vmem:[#allocation2] sm:$0xff]  ;;  %v1656_v34 = vld [vmem:[#allocation7 + $0x20] ss:$8 sps:$4 sm:$0xff]  }
  0x65   :  { %754 = vmatprep.subr.bf16.mxu0 %v1524_v16  ;;  %v1646_v16 = vld [vmem:[#allocation5 + $0xe0] ss:$8 sps:$4 sm:$0xff]   ;;  %v1652_v23 = vld [vmem:[#allocation7 + $0x4] ss:$8 sps:$4 sm:$0xff]   ;;  %v88_v26 = vpack.c.bf16 %v81_v21, %v81_v21  ;;  %v1655_v27 = vld [vmem:[#allocation7 + $0x14] ss:$8 sps:$4 sm:$0xff]  }
  0x66   :  { %710 = vmatpush1.bf16.msra.mxu1 %v1592_v38  ;;  %v1583_v22 = vld [vmem:[#allocation5 + $0x260] ss:$8 sps:$4 sm:$0xff]   ;;  %v1658_v31 = vld [vmem:[#allocation7 + $0x24] ss:$8 sps:$4 sm:$0xff]   ;;  %v1661_v35 = vld [vmem:[#allocation7 + $0x34] ss:$8 sps:$4 sm:$0xff]  }
  0x67   :  { %711 = vmatprep.subr.bf16.mxu1 %v1593_v39  ;;  %v1653_v30 = vld [vmem:[#allocation7 + $0x10] ss:$8 sps:$4 sm:$0xff]   ;;  %v1664_v39 = vld [vmem:[#allocation7 + $0x44] ss:$8 sps:$4 sm:$0xff]   ;;  %v1633_v53 = vld [vmem:[#allocation5 + $0x2e4] ss:$8 sps:$4 sm:$0xff]  }
  0x68   :  { %755 = vmatpush1.bf16.msra.mxu0 %v1526_v18  ;;  %v1577_v18 = vld [vmem:[#allocation5 + $0x250] ss:$8 sps:$4 sm:$0xff]   ;;  %v1659_v38 = vld [vmem:[#allocation7 + $0x30] ss:$8 sps:$4 sm:$0xff]  }
  0x69   :  { %756 = vmatprep.subr.bf16.mxu0 %v1527_v19  ;;  %v1585_v19 = vld [vmem:[#allocation5 + $0x264] ss:$8 sps:$4 sm:$0xff]   ;;  %v1674_v58 = vld [vmem:[#allocation7 + $0x80] ss:$8 sps:$4 sm:$0xff]   ;;  %v1643_v2 = vld [vmem:[#allocation5 + $0x300] ss:$8 sps:$4 sm:$0xff]  }
  0x6a   :  { %712 = vmatpush1.bf16.msra.mxu1 %v1598_v42  ;;  %v1662_v42 = vld [vmem:[#allocation7 + $0x40] ss:$8 sps:$4 sm:$0xff]  }
  0x6b   :  { %713 = vmatprep.subr.bf16.mxu1 %v1599_v43  ;;  %v1667_v43 = vld [vmem:[#allocation7 + $0x54] ss:$8 sps:$4 sm:$0xff]  }
  0x6c   :  { %757 = vmatpush1.bf16.msra.mxu0 %v1529_v24  ;;  %v1591_v24 = vld [vmem:[#allocation5 + $0x274] ss:$8 sps:$4 sm:$0xff]  }
  0x6d   :  { %758 = vmatprep.subr.bf16.mxu0 %v1530_v25  ;;  %v1650_v25 = vld [vmem:[#allocation7] ss:$8 sps:$4 sm:$0xff]  }
  0x6e   :  { %714 = vmatpush1.bf16.msra.mxu1 %v1604_v46  ;;  %v1665_v46 = vld [vmem:[#allocation7 + $0x50] ss:$8 sps:$4 sm:$0xff]  }
  0x6f   :  { %715 = vmatprep.subr.bf16.mxu1 %v1605_v47  ;;  %v1670_v47 = vld [vmem:[#allocation7 + $0x64] ss:$8 sps:$4 sm:$0xff]  }
  0x70   :  { %759 = vmatpush1.bf16.msra.mxu0 %v1532_v28  ;;  %v1589_v28 = vld [vmem:[#allocation5 + $0x270] ss:$8 sps:$4 sm:$0xff]  }
  0x71   :  { %760 = vmatprep.subr.bf16.mxu0 %v1533_v29  ;;  %v1597_v29 = vld [vmem:[#allocation5 + $0x284] ss:$8 sps:$4 sm:$0xff]  }
  0x72   :  { %716 = vmatpush1.bf16.msra.mxu1 %v1610_v50  ;;  %v1668_v50 = vld [vmem:[#allocation7 + $0x60] ss:$8 sps:$4 sm:$0xff]  }
  0x73   :  { %717 = vmatprep.subr.bf16.mxu1 %v1611_v52  ;;  %v1625_v52 = vld [vmem:[#allocation5 + $0x2d0] ss:$8 sps:$4 sm:$0xff]  }
  0x74   :  { %761 = vmatpush1.bf16.msra.mxu0 %v1535_v32  ;;  %v1595_v32 = vld [vmem:[#allocation5 + $0x280] ss:$8 sps:$4 sm:$0xff]  }
  0x75   :  { %762 = vmatprep.subr.bf16.mxu0 %v1536_v33  ;;  %v1603_v33 = vld [vmem:[#allocation5 + $0x294] ss:$8 sps:$4 sm:$0xff]  }
  0x76   :  { %718 = vmatpush1.bf16.msra.mxu1 %v1616_v55  ;;  %v1676_v55 = vld [vmem:[#allocation7 + $0x84] ss:$8 sps:$4 sm:$0xff]  }
  0x77   :  { %719 = vmatprep.subr.bf16.mxu1 %v1617_v56  ;;  %v1631_v56 = vld [vmem:[#allocation5 + $0x2e0] ss:$8 sps:$4 sm:$0xff]  }
  0x78   :  { %763 = vmatpush1.bf16.msra.mxu0 %v1538_v36  ;;  %v1601_v36 = vld [vmem:[#allocation5 + $0x290] ss:$8 sps:$4 sm:$0xff]  }
  0x79   :  { %764 = vmatprep.subr.bf16.mxu0 %v1539_v37  ;;  %v1609_v37 = vld [vmem:[#allocation5 + $0x2a4] ss:$8 sps:$4 sm:$0xff]  }
  0x7a   :  { %720 = vmatpush1.bf16.msra.mxu1 %v1622_v62  ;;  %v1645_v62 = vld [vmem:[#allocation5 + $0x304] ss:$8 sps:$4 sm:$0xff]  }
  0x7b   :  { %721 = vmatprep.subr.bf16.mxu1 %v1623_v63  ;;  %v1677_v63 = vld [vmem:[#allocation7 + $0x90] ss:$8 sps:$4 sm:$0xff]  }
  0x7c   :  { %765 = vmatpush1.bf16.msra.mxu0 %v1541_v40  ;;  %v1607_v40 = vld [vmem:[#allocation5 + $0x2a0] ss:$8 sps:$4 sm:$0xff]  }
  0x7d   :  { %766 = vmatprep.subr.bf16.mxu0 %v1542_v41  ;;  %v1615_v41 = vld [vmem:[#allocation5 + $0x2b4] ss:$8 sps:$4 sm:$0xff]  }
  0x7e   :  { %722 = vmatpush1.bf16.msra.mxu1 %v1628_v4  ;;  %v1685_v4 = vld [vmem:[#allocation7 + $0xb4] ss:$8 sps:$4 sm:$0xff]  }
  0x7f   :  { %723 = vmatprep.subr.bf16.mxu1 %v1629_v5  ;;  %v1840_v5 = vmov 0  }
  0x80   :  { %767 = vmatpush1.bf16.msra.mxu0 %v1544_v44  ;;  %v1613_v44 = vld [vmem:[#allocation5 + $0x2b0] ss:$8 sps:$4 sm:$0xff]  }
  0x81   :  { %768 = vmatprep.subr.bf16.mxu0 %v1545_v45  ;;  %v1621_v45 = vld [vmem:[#allocation5 + $0x2c4] ss:$8 sps:$4 sm:$0xff]  }
  0x82   :  { %724 = vmatpush1.bf16.msra.mxu1 %v1634_v8  ;;  %v87_v8 = vld [vmem:[#allocation2 + $0x30] sm:$0xff] }
  0x83   :  { %725 = vmatprep.subr.bf16.mxu1 %v1635_v9  ;;  %v1686_v9 = vld [vmem:[#allocation7 + $0xc0] ss:$8 sps:$4 sm:$0xff]  }
  0x84   :  { %769 = vmatpush1.bf16.msra.mxu0 %v1547_v48  ;;  %v1619_v48 = vld [vmem:[#allocation5 + $0x2c0] ss:$8 sps:$4 sm:$0xff]  }
  0x85   :  { %770 = vmatprep.subr.bf16.mxu0 %v1548_v49  ;;  %v1627_v49 = vld [vmem:[#allocation5 + $0x2d4] ss:$8 sps:$4 sm:$0xff]  }
  0x86   :  { %726 = vmatpush1.bf16.msra.mxu1 %v1640_v12  ;;  %v1691_v12 = vld [vmem:[#allocation7 + $0xd4] ss:$8 sps:$4 sm:$0xff]  }
  0x87   :  { %727 = vmatprep.subr.bf16.mxu1 %v1641_v13  ;;  %v1694_v13 = vld [vmem:[#allocation7 + $0xe4] ss:$8 sps:$4 sm:$0xff]  }
  0x88   :  { %771 = vmatpush1.bf16.msra.mxu0 %v1550_v51  ;;  %v1673_v51 = vld [vmem:[#allocation7 + $0x74] ss:$8 sps:$4 sm:$0xff]  }
  0x89   :  { %781 = vmatprep.subr.bf16.mxu0 %v1553_v54  ;;  %v1671_v54 = vld [vmem:[#allocation7 + $0x70] ss:$8 sps:$4 sm:$0xff]  }
  0x8a   :  { %728 = vmatpush1.bf16.msra.mxu1 %v1646_v16  ;;  %v1695_v16 = vld [vmem:[#allocation7 + $0xf0] ss:$8 sps:$4 sm:$0xff]  }
  0x8b   :  { %773 = vmatmul.mubr.bf16.vlgmr.msra.gmra.mrb[0].mxu0 %v90_v57  ;;  %729 = vmatprep.subr.bf16.mxu1 %v1647_v17  ;;  %v1639_v57 = vld [vmem:[#allocation5 + $0x2f4] ss:$8 sps:$4 sm:$0xff]  }
  0x8c   :  { %782 = vmatpush1.bf16.msra.mxu0 %v1551_v59  ;;  %813 = vmatprep.mubr.bf16.mxu0 %v93_v60  ;;  %v1679_v59 = vld [vmem:[#allocation7 + $0x94] ss:$8 sps:$4 sm:$0xff]   ;;  %v1637_v60 = vld [vmem:[#allocation5 + $0x2f0] ss:$8 sps:$4 sm:$0xff]  }
  0x8d   :  { %783 = vmatprep.subr.bf16.mxu0 %v1556_v61  ;;  %v85_v61 = vld [vmem:[#allocation2 + $0x20] sm:$0xff]  ;;  %v1698_v17 = vld [vmem:[#allocation8 + $0x40] sm:$0xff]  }
  0x8e   :  { %730 = vmatpush1.bf16.msra.mxu1 %v1649_v20  ;;  %v92_v0 = vpack.c.bf16 %v85_v61, %v85_v61 }
  0x8f   :  { %1071 = vmatprep.subr.bf16.mxu1 %v1652_v23 }
  0x90   :  { %784 = vmatpush1.bf16.msra.mxu0 %v1554_v1  ;;  %v1682_v1 = vld [vmem:[#allocation7 + $0xa4] ss:$8 sps:$4 sm:$0xff]  }
  0x91   :  { %785 = vmatprep.subr.bf16.mxu0 %v1561_v3  ;;  %732 = vmatmul.mubr.bf16.vlgmr.msra.gmra.mrb[0].mxu1 %v88_v26  ;;  %v1680_v3 = vld [vmem:[#allocation7 + $0xa0] ss:$8 sps:$4 sm:$0xff]  }
  0x92   :  { %1072 = vmatpush1.bf16.msra.mxu1 %v1650_v25  ;;  %v193_v25 = vld [vmem:[%s1959_s2] sm:$0x3] }
  0x93   :  { %1073 = vmatprep.subr.bf16.mxu1 %v1655_v27 }
  0x94   :  { %786 = vmatpush1.bf16.msra.mxu0 %v1559_v6  ;;  %v1683_v6 = vld [vmem:[#allocation7 + $0xb0] ss:$8 sps:$4 sm:$0xff]  }
  0x95   :  { %787 = vmatprep.subr.bf16.mxu0 %v1567_v7  ;;  %v1688_v7 = vld [vmem:[#allocation7 + $0xc4] ss:$8 sps:$4 sm:$0xff]  }
  0x96   :  { %1074 = vmatpush1.bf16.msra.mxu1 %v1653_v30 }
  0x97   :  { %1075 = vmatprep.subr.bf16.mxu1 %v1658_v31 }
  0x98   :  { %788 = vmatpush1.bf16.msra.mxu0 %v1565_v10  ;;  %v94_v10 = vpack.c.bf16 %v87_v8, %v87_v8 }
  0x99   :  { %789 = vmatprep.subr.bf16.mxu0 %v1573_v11  ;;  %v1689_v11 = vld [vmem:[#allocation7 + $0xd0] ss:$8 sps:$4 sm:$0xff]  }
  0x9a   :  { %1076 = vmatpush1.bf16.msra.mxu1 %v1656_v34 }
  0x9b   :  { %1077 = vmatprep.subr.bf16.mxu1 %v1661_v35 }
  0x9c   :  { %790 = vmatpush1.bf16.msra.mxu0 %v1571_v14  ;;  %v1692_v14 = vld [vmem:[#allocation7 + $0xe0] ss:$8 sps:$4 sm:$0xff]  }
  0x9d   :  { %791 = vmatprep.subr.bf16.mxu0 %v1579_v15  ;;  %v1697_v15 = vld [vmem:[#allocation7 + $0xf4] ss:$8 sps:$4 sm:$0xff]  }
  0x9e   :  { %1078 = vmatpush1.bf16.msra.mxu1 %v1659_v38 }
  0x9f   :  { %1079 = vmatprep.subr.bf16.mxu1 %v1664_v39 }
  0xa0   :  { %792 = vmatpush1.bf16.msra.mxu0 %v1577_v18 }
  0xa1   :  { %793 = vmatprep.subr.bf16.mxu0 %v1585_v19 }
  0xa2   :  { %1080 = vmatpush1.bf16.msra.mxu1 %v1662_v42  ;;  %v1700_v42 = vld [vmem:[#allocation8 + $0x48] sm:$0xff]  }
  0xa3   :  { %1081 = vmatprep.subr.bf16.mxu1 %v1667_v43  ;;  %v1701_v43 = vld [vmem:[#allocation8 + $0x8] sm:$0xff]  }
  0xa4   :  { %794 = vmatpush1.bf16.msra.mxu0 %v1583_v22  ;;  %v195_v22 = vlaneseq }
  0xa5   :  { %795 = vmatprep.subr.bf16.mxu0 %v1591_v24 }
  0xa6   :  { %1082 = vmatpush1.bf16.msra.mxu1 %v1665_v46  ;;  %v196_v23 = vshrl.u32 %v195_v22, 7  ;;  %v1704_v46 = vld [vmem:[#allocation8 + $0x58] sm:$0xff]  }
  0xa7   :  { %1083 = vmatprep.subr.bf16.mxu1 %v1670_v47  ;;  %v1705_v47 = vld [vmem:[#allocation8 + $0x18] sm:$0xff]  }
  0xa8   :  { %796 = vmatpush1.bf16.msra.mxu0 %v1589_v28  ;;  %v197_v24 = vsub.s32 0, %v196_v23  ;;  %v201_v26 = vsub.s32 1, %v196_v23 }
  0xa9   :  { %797 = vmatprep.subr.bf16.mxu0 %v1597_v29 }
  0xaa   :  { %1084 = vmatpush1.bf16.msra.mxu1 %v1668_v50  ;;  %v198_v27 = vrot.slane %v193_v25, %v197_v24  ;;  %v202_v28 = vrot.slane %v193_v25, %v201_v26  ;;  %v1708_v50 = vld [vmem:[#allocation8 + $0x68] sm:$0xff]  }
  0xab   :  { %1085 = vmatprep.subr.bf16.mxu1 %v1673_v51  ;;  %v1709_v51 = vld [vmem:[#allocation8 + $0x28] sm:$0xff]  }
  0xac   :  { %798 = vmatpush1.bf16.msra.mxu0 %v1595_v32 }
  0xad   :  { %799 = vmatprep.subr.bf16.mxu0 %v1603_v33 }
  0xae   :  { %1086 = vmatpush1.bf16.msra.mxu1 %v1671_v54  ;;  %v1712_v54 = vld [vmem:[#allocation8 + $0x78] sm:$0xff]  }
  0xaf   :  { %1087 = vmatprep.subr.bf16.mxu1 %v1676_v55  ;;  %v1713_v55 = vld [vmem:[#allocation8 + $0x38] sm:$0xff]  }
  0xb0   :  { %800 = vmatpush1.bf16.msra.mxu0 %v1601_v36 }
  0xb1   :  { %801 = vmatprep.subr.bf16.mxu0 %v1609_v37 }
  0xb2   :  { %1088 = vmatpush1.bf16.msra.mxu1 %v1674_v58 }
  0xb3   :  { %1089 = vmatprep.subr.bf16.mxu1 %v1679_v59 }
  0xb4   :  { %802 = vmatpush1.bf16.msra.mxu0 %v1607_v40  ;;  %v1699_v40 = vld [vmem:[#allocation8] sm:$0xff]  }
  0xb5   :  { %803 = vmatprep.subr.bf16.mxu0 %v1615_v41 }
  0xb6   :  { %1090 = vmatpush1.bf16.msra.mxu1 %v1677_v63 }
  0xb7   :  { %1091 = vmatprep.subr.bf16.mxu1 %v1682_v1 }
  0xb8   :  { %804 = vmatpush1.bf16.msra.mxu0 %v1613_v44  ;;  %v1702_v44 = vld [vmem:[#allocation8 + $0x50] sm:$0xff]  }
  0xb9   :  { %805 = vmatprep.subr.bf16.mxu0 %v1621_v45  ;;  %v1703_v45 = vld [vmem:[#allocation8 + $0x10] sm:$0xff]  }
  0xba   :  { %1092 = vmatpush1.bf16.msra.mxu1 %v1680_v3 }
  0xbb   :  { %1093 = vmatprep.subr.bf16.mxu1 %v1685_v4 }
  0xbc   :  { %806 = vmatpush1.bf16.msra.mxu0 %v1619_v48  ;;  %v1706_v48 = vld [vmem:[#allocation8 + $0x60] sm:$0xff]  }
  0xbd   :  { %807 = vmatprep.subr.bf16.mxu0 %v1627_v49  ;;  %v1707_v49 = vld [vmem:[#allocation8 + $0x20] sm:$0xff]  }
  0xbe   :  { %1094 = vmatpush1.bf16.msra.mxu1 %v1683_v6  ;;  %v1442_v6 = vld [vmem:[%s1963_s6] ss:$0 sm:$0xff] }
  0xbf   :  { %1095 = vmatprep.subr.bf16.mxu1 %v1688_v7 }
  0xc0   :  { %808 = vmatpush1.bf16.msra.mxu0 %v1625_v52  ;;  %v1710_v52 = vld [vmem:[#allocation8 + $0x70] sm:$0xff]  }
  0xc1   :  { %809 = vmatprep.subr.bf16.mxu0 %v1633_v53  ;;  %v1711_v53 = vld [vmem:[#allocation8 + $0x30] sm:$0xff]  }
  0xc2   :  { %1096 = vmatpush1.bf16.msra.mxu1 %v1686_v9 }
  0xc3   :  { %1097 = vmatprep.subr.bf16.mxu1 %v1691_v12 }
  0xc4   :  { %810 = vmatpush1.bf16.msra.mxu0 %v1631_v56  ;;  %v899_v56 = vld [vmem:[%s1961_s4] sm:$0x3]  ;;  %s1841_s4 = smov [#allocation10]  }
  0xc5   :  { %811 = vmatprep.subr.bf16.mxu0 %v1639_v57  ;;  %v904_v57 = vrot.slane %v899_v56, %v197_v24  ;;  %v908_v58 = vrot.slane %v899_v56, %v201_v26  ;;  %s1300_s30 = sshll.u32 %s1841_s4, 4  ;;  %s1301_s30 = int_to_ptr.vmem [resolvable:$true] %s1300_s30 }
  0xc6   :  { %1098 = vmatpush1.bf16.msra.mxu1 %v1689_v11  ;;  %s1802_s8 = scalar_lea.vmem %s1301_s30, 64  ;;  %p1807_p5 = scmp.lt.s32.totalorder %s1301_s30, %s1301_s30 }
  0xc7   :  { %1099 = vmatprep.subr.bf16.mxu1 %v1694_v13  ;;  %p1803_p4 = scmp.ne.s32.totalorder %s1301_s30, %s1802_s8  ;;  %p1808_p6 = scmp.lt.s32.totalorder %s1802_s8, %s1802_s8 }
  0xc8   :  { %812 = vmatpush1.bf16.msra.mxu0 %v1637_v60 }
  0xc9   :  { %822 = vmatprep.subr.bf16.mxu0 %v1645_v62  ;;  %p1809_p7 = por %p1808_p6, %p1807_p5 }
  0xca   :  { %1100 = vmatpush1.bf16.msra.mxu1 %v1692_v14 }
  0xcb   :  { %814 = vmatmul.mubr.bf16.vlgmr.msra.gmra.mrb[0].mxu0 %v92_v0  ;;  %1101 = vmatprep.subr.bf16.mxu1 %v1697_v15  ;;  %p1810_p8 = pnand %p1809_p7, %p1803_p4 }
  0xcc   :  { %823 = vmatpush1.bf16.msra.mxu0 %v1643_v2  ;;  %854 = vmatprep.mubr.bf16.mxu0 %v1840_v5 }
  0xce   :  { %1102 = vmatpush1.bf16.msra.mxu1 %v1695_v16 }
  0xcf   :  { %1459 = vmatprep.subr.bf16.mxu1 %v1698_v17 }
  0xd7   :  { %1409 = vmatmul.mubr.msk.bf16.vlgmr.msra.gmra.mrb[0].mxu0 %vm695_vm0, %v94_v10 }
 0x164   :  { %v733_v18 = vpop.f32.mrb[0].mxu1 }
 0x165   :  { %v735_v19 = vpop.f32.mrb[1].mxu1  ;;  %v734_v29 = vadd.f32 %v733_v18, %v198_v27 }
 0x166   :  { %v737_v20 = vpop.f32.mrb[2].mxu1  ;;  %v736_v30 = vadd.f32 %v735_v19, %v202_v28 }
 0x167   :  { %v738_v21 = vpop.f32.mrb[3].mxu1 }
 0x1aa   :  { %v856_v31 = vpop.f32.mrb[0].mxu0 }
 0x1ab   :  { %v1482_v32 = vadd.f32 %v856_v31, %v734_v29  ;;  %v858_v33 = vpop.f32.mrb[1].mxu0 }
 0x1ac   :  { %v1484_v34 = vadd.f32 %v858_v33, %v736_v30  ;;  %v860_v35 = vpop.f32.mrb[2].mxu0 }
 0x1ad   :  { %v863_v36 = vmax.f32 %v1482_v32, 0.0  ;;  %v861_v37 = vpop.f32.mrb[3].mxu0 }
 0x1ae   :  { %v864_v38 = vmax.f32 %v1484_v34, 0.0 }
 0x1af   :  { %v865_v41 = vpack.c.bf16 %v863_v36, %v863_v36 }
 0x1b0   :  { %v866_v39 = vpack.c.bf16 %v864_v38, %v864_v38 }
 0x1b2   :  { %1103 = vmatprep.mubr.bf16.mxu1 %v866_v39 }
 0x1b3   :  { %1104 = vmatmul.mubr.bf16.vlgmr.msra.gmra.mrb[4].mxu1 %v865_v41 }
 0x1b4   :  { %1460 = vmatpush3.bf16.msra.mxu1 %v1699_v40 }
 0x1b5   :  { %1461 = vmatprep.subr.bf16.mxu1 %v1700_v42 }
 0x1b8   :  { %1462 = vmatpush3.bf16.msra.mxu1 %v1701_v43 }
 0x1b9   :  { %1463 = vmatprep.subr.bf16.mxu1 %v1702_v44 }
 0x1bc   :  { %1464 = vmatpush3.bf16.msra.mxu1 %v1703_v45 }
 0x1bd   :  { %1465 = vmatprep.subr.bf16.mxu1 %v1704_v46 }
 0x1c0   :  { %1466 = vmatpush3.bf16.msra.mxu1 %v1705_v47 }
 0x1c1   :  { %1467 = vmatprep.subr.bf16.mxu1 %v1706_v48 }
 0x1c4   :  { %1468 = vmatpush3.bf16.msra.mxu1 %v1707_v49 }
 0x1c5   :  { %1469 = vmatprep.subr.bf16.mxu1 %v1708_v50 }
 0x1c8   :  { %1470 = vmatpush3.bf16.msra.mxu1 %v1709_v51 }
 0x1c9   :  { %1471 = vmatprep.subr.bf16.mxu1 %v1710_v52 }
 0x1cc   :  { %1472 = vmatpush3.bf16.msra.mxu1 %v1711_v53 }
 0x1cd   :  { %1473 = vmatprep.subr.bf16.mxu1 %v1712_v54 }
 0x1d0   :  { %1474 = vmatpush3.bf16.msra.mxu1 %v1713_v55 }
 0x286   :  { %v1105_v59 = vpop.f32.mrb[4].mxu1 }
 0x287   :  { %v1106_v60 = vadd.f32 %v1105_v59, %v904_v57  ;;  %v1107_v61 = vpop.f32.mrb[5].mxu1 }
 0x288   :  { %v1108_v62 = vadd.f32 %v1107_v61, %v908_v58  ;;  %v1109_v63 = vpop.f32.mrb[6].mxu1 }
 0x289   :  { %v1112_v0 = vmax.f32 %v1106_v60, 0.0  ;;  %v1110_v1 = vpop.f32.mrb[7].mxu1 }
 0x28a   :  { %v1113_v2 = vmax.f32 %v1108_v62, 0.0 }
 0x28b   :  { %v1114_v4 = vpack.c.bf16 %v1112_v0, %v1112_v0 }
 0x28c   :  { %v1115_v3 = vpack.c.bf16 %v1113_v2, %v1113_v2 }
 0x28e   :  { %1283 = vmatprep.mubr.bf16.mxu1 %v1115_v3 }
 0x28f   :  { %1284 = vmatmul.mubr.bf16.vlgmr.msra.gmra.mrb[8].mxu1 %v1114_v4 }
 0x362   :  { %v1475_v5 = vpop.f32.mrb[8].mxu1 }
 0x363   :  { %v1476_v7 = vpop.f32.mrb[9].mxu1 }
 0x364   :  { %v1477_v8 = vadd.f32 %v1476_v7, %v1475_v5  ;;  %v1478_v9 = vpop.f32.mrb[10].mxu1 }
 0x365   :  { %v1479_v10 = vpop.f32.mrb[11].mxu1 }
 0x366   :  { %v1286_v11 = vadd.f32 %v1477_v8, %v1442_v6 }
 0x368   :  { %v1291_v12 = vmax.f32 %v1286_v11, 0.0 }
 0x36a   :  { %v1292_v13 = vpack.c.bf16 %v1291_v12, %v1291_v12 }
 0x36c   :  { %1293 = vst [vmem:[#allocation10] sm:$0xf] %v1292_v13 }
 0x36d   :  { %1813 = shalt.err (!%p1810_p8)
}
 0x36e   :  { %s1814_s10 = scalar_lea.hbm %s1964_s7, 64 }
 0x36f   :  { %p1815_p9 = scmp.ne.s32.totalorder %s1964_s7, %s1814_s10  ;;  %p1818_p10 = scmp.lt.u32.totalorder %s1814_s10, %s1964_s7 }
 0x371   :  { %p1820_p11 = pnand %p1818_p10, %p1815_p9 }
 0x373   :  { %1823 = shalt.err (!%p1820_p11)
}
 0x374   :  { %1303 = dma.vmem_to_hbm [thread:$0]  %s1301_s30, 64, %s1964_s7, [#allocation4]  }
 0x375   :  { %1830 = dma.done.wait [#allocation4], 64  }
 0x376   :  { %1831 = vsyncadd [#allocation4], 4294967232 }
 0x377   :  { %1307 = vsyncpa [#allocation3], 1 }
 0x378   :  { %1308 = vsyncpa [#allocation6], 1 }
 0x379   :  { %1309 = vsyncpa [#allocation9], 1 }
 0x37a   :  { %1310 = vsyncpa [#allocation4], 1 }

</bundles_post_ra>
